<compile_context>
chip_gen: v5e
topology: v5e:2x2
jax: 0.10.0
libtpu: 0.0.40
codegen_flags: <defaults>
</compile_context>

<pallas_src>
import jax
import jax.numpy as jnp
from jax import lax
from jax.experimental import pallas as pl
from jax.experimental.pallas import tpu as pltpu

# --- hyperparameters (small, consistent with the module's __init__) --------
VOCAB_SIZE = 50
EMBED_DIM = 32
NUM_FILTERS = 8
FILTER_SIZES = (2, 3, 4)
FS_MAX = max(FILTER_SIZES)                        # 4
CAT_DIM = len(FILTER_SIZES) * NUM_FILTERS         # 24
OUTPUT_DIM = 4
DROPOUT_P = 0.5                                   # identity at inference
BATCH = 2
SEQ_LEN = 16


def textcnn_kernel(ids_ref, table_ref, convp_ref, fcp_ref, out_ref):
    bs, fs_max = ids_ref.shape                    # [B*S, fs_max] int32
    vocab, emb_dim = table_ref.shape              # [V, E]
    b = out_ref.shape[0]
    s = bs // b
    cat = convp_ref.shape[1]                      # 3 * NF
    k_dim = fs_max * emb_dim                      # 128

    # 1) Embedding gather fused in-kernel: one-hot rows @ table on the MXU.
    #    Column k of the window-id array holds the token at time t+k, so slab
    #    k is the tap-k embedding; the lane concat is a dense [B*S, 128]
    #    im2col operand (K matches the MXU contraction width).
    table = table_ref[...]
    vocab_iota = lax.broadcasted_iota(jnp.int32, (bs, vocab), 1)
    slabs = []
    for k in range(fs_max):                       # static taps
        onehot = (ids_ref[:, k:k + 1] == vocab_iota).astype(jnp.float32)
        slabs.append(jnp.dot(onehot, table, preferred_element_type=jnp.float32))
    im2col = jnp.concatenate(slabs, axis=-1)      # [B*S, fs_max*E] = [32, 128]

    # 2) All three convs as ONE K=128 matmul against the host-packed weight
    #    matrix, then bias + ReLU.
    conv_w = convp_ref[0:k_dim, :]                # [128, 3*NF]
    conv_b = convp_ref[k_dim:k_dim + 1, :]        # [1, 3*NF]
    scores = jnp.dot(im2col, conv_w, preferred_element_type=jnp.float32)
    scores = jnp.maximum(scores + conv_b, 0.0)    # ReLU, [B*S, 3*NF]

    # 3) Mask time positions past each filter's valid length L = S - fs + 1
    #    (0 is a safe fill value: the post-ReLU valid max is always >= 0),
    #    then max-pool over time per batch row.  No pooled-fragment concat.
    scores3 = scores.reshape(b, s, cat)
    t_pos = lax.broadcasted_iota(jnp.int32, (b, s, cat), 1)
    col = lax.broadcasted_iota(jnp.int32, (b, s, cat), 2)
    limit = jnp.zeros((b, s, cat), jnp.int32)
    for i, fsz in enumerate(FILTER_SIZES):        # static filter groups
        in_grp = (col >= i * NUM_FILTERS) & (col < (i + 1) * NUM_FILTERS)
        limit = jnp.where(in_grp, s - fsz + 1, limit)
    pooled = jnp.max(jnp.where(t_pos < limit, scores3, 0.0), axis=1)  # [B, 3*NF]

    # 4) fc head.
    # TODO(synk): dropout treated as identity (eval/inference mode); training
    # dropout would need pltpu.prng_seed + pltpu.stateful_bernoulli.
    fc_w = fcp_ref[0:cat, :]                      # [3*NF, OUT]
    fc_b = fcp_ref[cat:cat + 1, :]                # [1, OUT]
    out = jnp.dot(pooled, fc_w, preferred_element_type=jnp.float32) + fc_b
    out_ref[...] = out.astype(out_ref.dtype)


def init_params(key):
    ks = jax.random.split(key, 2 * len(FILTER_SIZES) + 3)
    params = {
        'embedding': jax.random.normal(ks[0], (VOCAB_SIZE, EMBED_DIM),
                                       jnp.float32) * 0.1,
    }
    for i, fs in enumerate(FILTER_SIZES):
        params[f'conv{i}_w'] = jax.random.normal(
            ks[1 + 2 * i], (fs, EMBED_DIM, NUM_FILTERS), jnp.float32) * 0.1
        params[f'conv{i}_b'] = jax.random.normal(
            ks[2 + 2 * i], (1, NUM_FILTERS), jnp.float32) * 0.1
    params['fc_w'] = jax.random.normal(
        ks[-2], (CAT_DIM, OUTPUT_DIM), jnp.float32) * 0.1
    params['fc_b'] = jax.random.normal(ks[-1], (1, OUTPUT_DIM),
                                       jnp.float32) * 0.1
    return params


def pack_params(params):
    """One-time host-side packing: conv taps -> one [fs_max*E, 3*NF] matrix
    with the bias appended as an extra row; fc weight + bias stacked."""
    blocks, biases = [], []
    for i, fs in enumerate(FILTER_SIZES):
        w = params[f'conv{i}_w']                               # [fs, E, NF]
        pad = jnp.zeros((FS_MAX - fs, EMBED_DIM, NUM_FILTERS), jnp.float32)
        blocks.append(jnp.concatenate([w, pad], axis=0)
                      .reshape(FS_MAX * EMBED_DIM, NUM_FILTERS))
        biases.append(params[f'conv{i}_b'])                    # [1, NF]
    conv_w = jnp.concatenate(blocks, axis=1)                   # [128, 3*NF]
    conv_b = jnp.concatenate(biases, axis=1)                   # [1, 3*NF]
    return {
        'embedding': params['embedding'],                      # [V, E]
        'conv_packed': jnp.concatenate([conv_w, conv_b], axis=0),          # [129, 24]
        'fc_packed': jnp.concatenate([params['fc_w'], params['fc_b']], 0),  # [25, 4]
    }


def _window_ids(text):
    """[B, S] tokens -> [B*S, fs_max] int32 where column k is the token at
    time t+k (tail positions repeat the last token; they are masked in-kernel).
    Pure int32 index glue — the embedding gather itself runs in the kernel."""
    b, s = text.shape
    text = text.astype(jnp.int32)
    pad = jnp.tile(text[:, -1:], (1, FS_MAX - 1))
    ext = jnp.concatenate([text, pad], axis=1)                 # [B, S+fs_max-1]
    cols = [ext[:, k:k + s] for k in range(FS_MAX)]
    return jnp.stack(cols, axis=-1).reshape(b * s, FS_MAX)


@jax.jit
def textcnn_forward(text, packed):
    ids = _window_ids(text)
    b = text.shape[0]
    vmem = pl.BlockSpec(memory_space=pltpu.MemorySpace.VMEM)
    # Gridless: all operands (< 120 KB total) live in VMEM for the whole call.
    # If BATCH ever grows beyond toy size, add grid=(B//tb,) over batch with
    # dimension_semantics=("parallel",) so v7x's two TensorCores both work.
    return pl.pallas_call(
        textcnn_kernel,
        out_shape=jax.ShapeDtypeStruct((b, OUTPUT_DIM), jnp.float32),
        in_specs=[vmem, vmem, vmem, vmem],
        out_specs=vmem,
    )(ids, packed['embedding'], packed['conv_packed'], packed['fc_packed'])


def reference_forward(text, params):
    """Pure-JAX reference mirroring the PyTorch forward (eval mode)."""
    emb = jnp.take(params['embedding'], text.astype(jnp.int32), axis=0)
    pooled = []
    for i, fs in enumerate(FILTER_SIZES):
        w, b = params[f'conv{i}_w'], params[f'conv{i}_b']
        L = emb.shape[1] - fs + 1
        acc = sum(jnp.einsum('ble,ef->blf', emb[:, k:k + L, :], w[k])
                  for k in range(fs))
        conved = jax.nn.relu(acc + b)
        pooled.append(jnp.max(conved, axis=1))
    cat = jnp.concatenate(pooled, axis=-1)
    return cat @ params['fc_w'] + params['fc_b']


if __name__ == "__main__":
    key = jax.random.PRNGKey(0)
    k_param, k_text = jax.random.split(key)
    params = init_params(k_param)
    packed = pack_params(params)
    text = jax.random.randint(k_text, (BATCH, SEQ_LEN), 0, VOCAB_SIZE,
                              dtype=jnp.int32)

    out = jax.block_until_ready(textcnn_forward(text, packed))

    ref = reference_forward(text, params)
    assert out.shape == (BATCH, OUTPUT_DIM)
    assert jnp.allclose(out, ref, atol=1e-5, rtol=1e-5)
    print("KERNEL_OK")
</pallas_src>

<mosaic_0001>
module attributes {stable_mosaic.version = 11 : i64} {
  func.func @textcnn_kernel(%arg0: memref<32x4xi32, #tpu.memory_space<vmem>>, %arg1: memref<50x32xf32, #tpu.memory_space<vmem>>, %arg2: memref<129x24xf32, #tpu.memory_space<vmem>>, %arg3: memref<25x4xf32, #tpu.memory_space<vmem>>, %arg4: memref<2x4xf32, #tpu.memory_space<vmem>>) attributes {dimension_semantics = [], scalar_prefetch = 0 : i64, scratch_operands = 0 : i64, tpu.core_type = #tpu.core_type<tc>} {
    %c0 = arith.constant 0 : index
    %c0_0 = arith.constant 0 : index
    %0 = vector.load %arg1[%c0, %c0_0] : memref<50x32xf32, #tpu.memory_space<vmem>>, vector<50x32xf32>
    %1 = tpu.iota {dimensions = array<i32: 1>} : vector<32x50xi32>
    %c0_1 = arith.constant 0 : index
    %c0_2 = arith.constant 0 : index
    %2 = vector.load %arg0[%c0_1, %c0_2] : memref<32x4xi32, #tpu.memory_space<vmem>>, vector<32x1xi32>
    %3 = vector.broadcast %2 : vector<32x1xi32> to vector<32x50xi32>
    %4 = arith.cmpi eq, %3, %1 : vector<32x50xi32>
    %5 = arith.extui %4 : vector<32x50xi1> to vector<32x50xi32>
    %6 = arith.sitofp %5 : vector<32x50xi32> to vector<32x50xf32>
    %cst = arith.constant dense<0.000000e+00> : vector<32x32xf32>
    %7 = tpu.matmul %6, %0, %cst {dimension_numbers = #tpu.dot_dimension_numbers<[1], [0], [0], [1], [0, 0, 1, 1], [], []>} : vector<32x50xf32>, vector<50x32xf32>, vector<32x32xf32> -> vector<32x32xf32>
    %c0_3 = arith.constant 0 : index
    %c1 = arith.constant 1 : index
    %8 = vector.load %arg0[%c0_3, %c1] : memref<32x4xi32, #tpu.memory_space<vmem>>, vector<32x1xi32>
    %9 = vector.broadcast %8 : vector<32x1xi32> to vector<32x50xi32>
    %10 = arith.cmpi eq, %9, %1 : vector<32x50xi32>
    %11 = arith.extui %10 : vector<32x50xi1> to vector<32x50xi32>
    %12 = arith.sitofp %11 : vector<32x50xi32> to vector<32x50xf32>
    %cst_4 = arith.constant dense<0.000000e+00> : vector<32x32xf32>
    %13 = tpu.matmul %12, %0, %cst_4 {dimension_numbers = #tpu.dot_dimension_numbers<[1], [0], [0], [1], [0, 0, 1, 1], [], []>} : vector<32x50xf32>, vector<50x32xf32>, vector<32x32xf32> -> vector<32x32xf32>
    %c0_5 = arith.constant 0 : index
    %c2 = arith.constant 2 : index
    %14 = vector.load %arg0[%c0_5, %c2] : memref<32x4xi32, #tpu.memory_space<vmem>>, vector<32x1xi32>
    %15 = vector.broadcast %14 : vector<32x1xi32> to vector<32x50xi32>
    %16 = arith.cmpi eq, %15, %1 : vector<32x50xi32>
    %17 = arith.extui %16 : vector<32x50xi1> to vector<32x50xi32>
    %18 = arith.sitofp %17 : vector<32x50xi32> to vector<32x50xf32>
    %cst_6 = arith.constant dense<0.000000e+00> : vector<32x32xf32>
    %19 = tpu.matmul %18, %0, %cst_6 {dimension_numbers = #tpu.dot_dimension_numbers<[1], [0], [0], [1], [0, 0, 1, 1], [], []>} : vector<32x50xf32>, vector<50x32xf32>, vector<32x32xf32> -> vector<32x32xf32>
    %c0_7 = arith.constant 0 : index
    %c3 = arith.constant 3 : index
    %20 = vector.load %arg0[%c0_7, %c3] : memref<32x4xi32, #tpu.memory_space<vmem>>, vector<32x1xi32>
    %21 = vector.broadcast %20 : vector<32x1xi32> to vector<32x50xi32>
    %22 = arith.cmpi eq, %21, %1 : vector<32x50xi32>
    %23 = arith.extui %22 : vector<32x50xi1> to vector<32x50xi32>
    %24 = arith.sitofp %23 : vector<32x50xi32> to vector<32x50xf32>
    %cst_8 = arith.constant dense<0.000000e+00> : vector<32x32xf32>
    %25 = tpu.matmul %24, %0, %cst_8 {dimension_numbers = #tpu.dot_dimension_numbers<[1], [0], [0], [1], [0, 0, 1, 1], [], []>} : vector<32x50xf32>, vector<50x32xf32>, vector<32x32xf32> -> vector<32x32xf32>
    %26 = tpu.concatenate %7, %13, %19, %25 in 1 : vector<32x32xf32>, vector<32x32xf32>, vector<32x32xf32>, vector<32x32xf32> -> vector<32x128xf32>
    %c0_9 = arith.constant 0 : index
    %c0_10 = arith.constant 0 : index
    %27 = vector.load %arg2[%c0_9, %c0_10] : memref<129x24xf32, #tpu.memory_space<vmem>>, vector<128x24xf32>
    %c128 = arith.constant 128 : index
    %c0_11 = arith.constant 0 : index
    %28 = vector.load %arg2[%c128, %c0_11] : memref<129x24xf32, #tpu.memory_space<vmem>>, vector<1x24xf32>
    %cst_12 = arith.constant dense<0.000000e+00> : vector<32x24xf32>
    %29 = tpu.matmul %26, %27, %cst_12 {dimension_numbers = #tpu.dot_dimension_numbers<[1], [0], [0], [1], [0, 0, 1, 1], [], []>} : vector<32x128xf32>, vector<128x24xf32>, vector<32x24xf32> -> vector<32x24xf32>
    %30 = vector.broadcast %28 : vector<1x24xf32> to vector<32x24xf32>
    %31 = arith.addf %29, %30 : vector<32x24xf32>
    %cst_13 = arith.constant 0.000000e+00 : f32
    %32 = vector.broadcast %cst_13 : f32 to vector<32x24xf32>
    %33 = arith.maximumf %31, %32 : vector<32x24xf32>
    %34 = vector.shape_cast %33 : vector<32x24xf32> to vector<2x16x24xf32>
    %35 = tpu.iota {dimensions = array<i32: 1>} : vector<2x16x24xi32>
    %36 = tpu.iota {dimensions = array<i32: 2>} : vector<2x16x24xi32>
    %c0_i32 = arith.constant 0 : i32
    %37 = vector.broadcast %c0_i32 : i32 to vector<2x16x24xi32>
    %c0_i32_14 = arith.constant 0 : i32
    %38 = vector.broadcast %c0_i32_14 : i32 to vector<2x16x24xi32>
    %39 = arith.cmpi sge, %36, %38 : vector<2x16x24xi32>
    %c8_i32 = arith.constant 8 : i32
    %40 = vector.broadcast %c8_i32 : i32 to vector<2x16x24xi32>
    %41 = arith.cmpi slt, %36, %40 : vector<2x16x24xi32>
    %42 = arith.andi %39, %41 : vector<2x16x24xi1>
    %c15_i32 = arith.constant 15 : i32
    %43 = vector.broadcast %c15_i32 : i32 to vector<2x16x24xi32>
    %44 = arith.select %42, %43, %37 : vector<2x16x24xi1>, vector<2x16x24xi32>
    %c8_i32_15 = arith.constant 8 : i32
    %45 = vector.broadcast %c8_i32_15 : i32 to vector<2x16x24xi32>
    %46 = arith.cmpi sge, %36, %45 : vector<2x16x24xi32>
    %c16_i32 = arith.constant 16 : i32
    %47 = vector.broadcast %c16_i32 : i32 to vector<2x16x24xi32>
    %48 = arith.cmpi slt, %36, %47 : vector<2x16x24xi32>
    %49 = arith.andi %46, %48 : vector<2x16x24xi1>
    %c14_i32 = arith.constant 14 : i32
    %50 = vector.broadcast %c14_i32 : i32 to vector<2x16x24xi32>
    %51 = arith.select %49, %50, %44 : vector<2x16x24xi1>, vector<2x16x24xi32>
    %c16_i32_16 = arith.constant 16 : i32
    %52 = vector.broadcast %c16_i32_16 : i32 to vector<2x16x24xi32>
    %53 = arith.cmpi sge, %36, %52 : vector<2x16x24xi32>
    %c24_i32 = arith.constant 24 : i32
    %54 = vector.broadcast %c24_i32 : i32 to vector<2x16x24xi32>
    %55 = arith.cmpi slt, %36, %54 : vector<2x16x24xi32>
    %56 = arith.andi %53, %55 : vector<2x16x24xi1>
    %c13_i32 = arith.constant 13 : i32
    %57 = vector.broadcast %c13_i32 : i32 to vector<2x16x24xi32>
    %58 = arith.select %56, %57, %51 : vector<2x16x24xi1>, vector<2x16x24xi32>
    %59 = arith.cmpi slt, %35, %58 : vector<2x16x24xi32>
    %cst_17 = arith.constant 0.000000e+00 : f32
    %60 = vector.broadcast %cst_17 : f32 to vector<2x16x24xf32>
    %61 = arith.select %59, %34, %60 : vector<2x16x24xi1>, vector<2x16x24xf32>
    %cst_18 = arith.constant dense<0xFF800000> : vector<2x24xf32>
    %62 = vector.multi_reduction <maximumf>, %61, %cst_18 [1] : vector<2x16x24xf32> to vector<2x24xf32>
    %c0_19 = arith.constant 0 : index
    %c0_20 = arith.constant 0 : index
    %63 = vector.load %arg3[%c0_19, %c0_20] : memref<25x4xf32, #tpu.memory_space<vmem>>, vector<24x4xf32>
    %c24 = arith.constant 24 : index
    %c0_21 = arith.constant 0 : index
    %64 = vector.load %arg3[%c24, %c0_21] : memref<25x4xf32, #tpu.memory_space<vmem>>, vector<1x4xf32>
    %cst_22 = arith.constant dense<0.000000e+00> : vector<2x4xf32>
    %65 = tpu.matmul %62, %63, %cst_22 {dimension_numbers = #tpu.dot_dimension_numbers<[1], [0], [0], [1], [0, 0, 1, 1], [], []>} : vector<2x24xf32>, vector<24x4xf32>, vector<2x4xf32> -> vector<2x4xf32>
    %66 = vector.broadcast %64 : vector<1x4xf32> to vector<2x4xf32>
    %67 = arith.addf %65, %66 : vector<2x4xf32>
    %c0_23 = arith.constant 0 : index
    %c0_24 = arith.constant 0 : index
    %68 = vector.load %arg4[%c0_23, %c0_24] : memref<2x4xf32, #tpu.memory_space<vmem>>, vector<2x4xf32>
    tpu.vector_store %arg4[%c0_23, %c0_24], %67 {strides = array<i32>} : memref<2x4xf32, #tpu.memory_space<vmem>>, vector<2x4xf32>,
    return
  }
}

</mosaic_0001>

<bundles_post_ra>
// kernel: textcnn_forward.1
= control target key start
LH: loop header
LB: loop body
LE: loop exit
PB: predicated region body
PF: predicated region fallthrough
CT: control target
= control target key end

     0   :  { %v638_v1 = vmov 2   ;;  %v639_v2 = vmov 1   ;;  %s843_s0 = inlined_call_operand.vmem [shape: s32[32,4], index: 0, kind: input, shape index: {}]   ;;  %s844_s1 = inlined_call_operand.vmem [shape: f32[50,32], index: 1, kind: input, shape index: {}]   ;;  %s845_s2 = inlined_call_operand.vmem [shape: f32[129,24], index: 2, kind: input, shape index: {}]   ;;  %s846_s3 = inlined_call_operand.vmem [shape: f32[25,4], index: 3, kind: input, shape index: {}]   ;;  %s847_s4 = inlined_call_operand.hbm [shape: f32[2,4], index: 4, kind: output, shape index: {}]  }
   0x1   :  { %v675_v0 = vld [vmem:[%s843_s0] sm:$0xff]  ;;  %577 = vset.pattern.permute.xlu0 %v638_v1  ;;  %579 = vset.pattern.permute.xlu1 %v639_v2 }
   0x2   :  { %102 = vperm.xlu1 %579, %v675_v0   ;;  %167 = vperm.xlu0 %577, %v675_v0  }
   0x3   :  { %9 = vsyncpa [#allocation3], 0  ;;  %v28_v3 = vld [vmem:[%s843_s0 + $0x8] sm:$0xff]  ;;  %v640_v4 = vmov 3   ;;  %v24_v5 = vld [vmem:[%s844_s1 + $0x30] sm:$0x3]  ;;  %v25_v16 = vlaneseq }
   0x4   :  { %581 = vset.pattern.permute.xlu2 %v640_v4  ;;  %vm68_vm0 = vcmask 1041408   ;;  %v23_v6 = vld [vmem:[%s844_s1 + $0x28] sm:$0xff]  ;;  %v22_v7 = vld [vmem:[%s844_s1 + $0x20] sm:$0xff]  ;;  %v21_v8 = vld [vmem:[%s844_s1 + $0x18] sm:$0xff]  ;;  %v641_v13 = vmov 0   ;;  %vm55_vm1 = vcmask 408576  }
   0x5   :  { %235 = vperm.xlu2 %581, %v28_v3   ;;  %521 = vmatpush.msk.msra.mxu2 %vm68_vm0, %v24_v5  ;;  %v20_v9 = vld [vmem:[%s844_s1 + $0x10] sm:$0xff]  ;;  %v30_v11 = vld [vmem:[%s843_s0 + $0x18] sm:$0xff]  ;;  %v19_v12 = vld [vmem:[%s844_s1 + $0x8] sm:$0xff]  ;;  %v715_v17 = vand.u32 127, %v25_v16  ;;  %v642_v20 = vmov 0.0   ;;  %s645_s11 = smov 96  }
   0x6   :  { %512 = vmatpush.msk.msra.mxu1 %vm68_vm0, %v24_v5  ;;  %530 = vmatpush.msk.msra.mxu3 %vm68_vm0, %v24_v5  ;;  %v29_v10 = vld [vmem:[%s843_s0 + $0x10] sm:$0xff]  ;;  %v18_v14 = vld [vmem:[%s844_s1] sm:$0xff]  ;;  %s643_s0 = smov 32   ;;  %s644_s1 = smov 64  }
   0x7   :  { %503 = vmatpush.msk.msra.mxu0 %vm68_vm0, %v24_v5  ;;  %212 = vmatpush.msra.mxu2 %v23_v6  ;;  %v371_v5 = vld [vmem:[%s845_s2 + $0x60] sm:$0xff]  ;;  %s646_s25 = smov [#allocation2]   ;;  %s490_s29 = sshll.u32 %s847_s4, 4  ;;  %s491_s29 = int_to_ptr.hbm [resolvable:$true] %s490_s29 }
   0x8   :  { %147 = vmatpush.msra.mxu1 %v23_v6  ;;  %277 = vmatpush.msra.mxu3 %v23_v6  ;;  %s488_s26 = sshll.u32 %s646_s25, 4  ;;  %s489_s26 = int_to_ptr.vmem [resolvable:$true] %s488_s26 }
   0x9   :  { %82 = vmatpush.msra.mxu0 %v23_v6  ;;  %213 = vmatpush.msra.mxu2 %v22_v7  ;;  %v370_v6 = vld [vmem:[%s845_s2 + $0x58] sm:$0xff] }
   0xa   :  { %148 = vmatpush.msra.mxu1 %v22_v7  ;;  %580 = vset.pattern.permute.xlu1 %v638_v1 }
   0xb   :  { %578 = vset.pattern.permute.xlu0 %v640_v4  ;;  %170 = vperm.xlu1 %580, %v28_v3  }
   0xc   :  { %232 = vperm.xlu0 %578, %v675_v0   ;;  %214 = vmatpush.msra.mxu2 %v21_v8 }
   0xd   :  { %582 = vset.pattern.permute.xlu2 %v639_v2  ;;  %149 = vmatpush.msra.mxu1 %v21_v8 }
   0xe   :  { %105 = vperm.xlu2 %582, %v28_v3   ;;  %215 = vmatpush.msra.mxu2 %v20_v9 }
   0xf   :  { %278 = vmatpush.msra.mxu3 %v22_v7  ;;  %150 = vmatpush.msra.mxu1 %v20_v9 }
  0x10   :  { %83 = vmatpush.msra.mxu0 %v22_v7  ;;  %216 = vmatpush.msra.mxu2 %v19_v12  ;;  %v369_v7 = vld [vmem:[%s845_s2 + $0x50] sm:$0xff] }
  0x11   :  { %279 = vmatpush.msra.mxu3 %v21_v8  ;;  %151 = vmatpush.msra.mxu1 %v19_v12 }
  0x12   :  { %84 = vmatpush.msra.mxu0 %v21_v8  ;;  %217 = vmatpush.msra.mxu2 %v18_v14  ;;  %v368_v8 = vld [vmem:[%s845_s2 + $0x48] sm:$0xff] }
  0x13   :  { %280 = vmatpush.msra.mxu3 %v20_v9  ;;  %173 = vperm.xlu1 %580, %v29_v10  }
  0x14   :  { %584 = vset.pattern.permute.xlu0 %v639_v2  ;;  %85 = vmatpush.msra.mxu0 %v20_v9  ;;  %v367_v9 = vld [vmem:[%s845_s2 + $0x40] sm:$0xff] }
  0x15   :  { %108 = vperm.xlu0 %584, %v29_v10   ;;  %152 = vmatpush.msra.mxu1 %v18_v14 }
  0x16   :  { %583 = vset.pattern.permute.xlu2 %v640_v4  ;;  %281 = vmatpush.msra.mxu3 %v19_v12 }
  0x17   :  { %238 = vperm.xlu2 %583, %v29_v10   ;;  %86 = vmatpush.msra.mxu0 %v19_v12  ;;  %v364_v12 = vld [vmem:[%s845_s2 + $0x28] sm:$0xff] }
  0x18   :  { %282 = vmatpush.msra.mxu3 %v18_v14 }
  0x19   :  { %87 = vmatpush.msra.mxu0 %v18_v14  ;;  %v363_v14 = vld [vmem:[%s845_s2 + $0x20] sm:$0xff] }
  0x1b   :  { %176 = vperm.xlu1 %580, %v30_v11  }
  0x1d   :  { %587 = vset.pattern.permute.xlu0 %v641_v13 }
  0x1e   :  { %35 = vperm.xlu0 %587, %v28_v3   ;;  %v373_v3 = vld [vmem:[%s845_s2 + $0x70] sm:$0xff] }
  0x1f   :  { %241 = vperm.xlu2 %583, %v30_v11  }
  0x23   :  { %585 = vset.pattern.permute.xlu1 %v639_v2  ;;  %v374_v2 = vld [vmem:[%s845_s2 + $0x78] sm:$0xff] }
  0x24   :  { %111 = vperm.xlu1 %585, %v30_v11   ;;  %536 = vmatpush.msrb.mxu2 %v374_v2 }
  0x25   :  { %537 = vmatpush.msrb.mxu3 %v374_v2  ;;  %377 = vmatpush.msrb.mxu0 %v374_v2 }
  0x26   :  { %609 = vset.pattern.permute.xlu0 %v640_v4  ;;  %v372_v4 = vld [vmem:[%s845_s2 + $0x68] sm:$0xff]  ;;  %538 = vmatpush.msrb.mxu2 %v373_v3 }
  0x27   :  { %586 = vset.pattern.permute.xlu2 %v641_v13  ;;  %539 = vmatpush.msrb.mxu3 %v373_v3 }
  0x28   :  { %32 = vperm.xlu2 %586, %v675_v0   ;;  %378 = vmatpush.msrb.mxu0 %v373_v3 }
  0x29   :  { %540 = vmatpush.msrb.mxu2 %v372_v4  ;;  %541 = vmatpush.msrb.mxu3 %v372_v4 }
  0x2a   :  { %379 = vmatpush.msrb.mxu0 %v372_v4 }
  0x2b   :  { %542 = vmatpush.msrb.mxu2 %v371_v5  ;;  %543 = vmatpush.msrb.mxu3 %v371_v5 }
  0x2c   :  { %588 = vset.pattern.permute.xlu1 %v641_v13  ;;  %380 = vmatpush.msrb.mxu0 %v371_v5 }
  0x2d   :  { %38 = vperm.xlu1 %588, %v29_v10   ;;  %544 = vmatpush.msrb.mxu2 %v370_v6  ;;  %v366_v10 = vld [vmem:[%s845_s2 + $0x38] sm:$0xff] }
  0x2e   :  { %545 = vmatpush.msrb.mxu3 %v370_v6  ;;  %381 = vmatpush.msrb.mxu0 %v370_v6 }
  0x2f   :  { %546 = vmatpush.msrb.mxu2 %v369_v7 }
  0x30   :  { %41 = vperm.xlu2 %586, %v30_v11   ;;  %547 = vmatpush.msrb.mxu3 %v369_v7  ;;  %v365_v11 = vld [vmem:[%s845_s2 + $0x30] sm:$0xff] }
  0x31   :  { %382 = vmatpush.msrb.mxu0 %v369_v7  ;;  %548 = vmatpush.msrb.mxu2 %v368_v8 }
  0x32   :  { %549 = vmatpush.msrb.mxu3 %v368_v8 }
  0x33   :  { %383 = vmatpush.msrb.mxu0 %v368_v8  ;;  %550 = vmatpush.msrb.mxu2 %v367_v9 }
  0x34   :  { %551 = vmatpush.msrb.mxu3 %v367_v9 }
  0x35   :  { %384 = vmatpush.msrb.mxu0 %v367_v9  ;;  %552 = vmatpush.msrb.mxu2 %v366_v10 }
  0x36   :  { %553 = vmatpush.msrb.mxu3 %v366_v10 }
  0x37   :  { %385 = vmatpush.msrb.mxu0 %v366_v10  ;;  %554 = vmatpush.msrb.mxu2 %v365_v11 }
  0x38   :  { %555 = vmatpush.msrb.mxu3 %v365_v11 }
  0x39   :  { %386 = vmatpush.msrb.mxu0 %v365_v11  ;;  %556 = vmatpush.msrb.mxu2 %v364_v12 }
  0x3a   :  { %557 = vmatpush.msrb.mxu3 %v364_v12 }
  0x3b   :  { %387 = vmatpush.msrb.mxu0 %v364_v12  ;;  %558 = vmatpush.msrb.mxu2 %v363_v14 }
  0x3c   :  { %559 = vmatpush.msrb.mxu3 %v363_v14 }
  0x3d   :  { %388 = vmatpush.msrb.mxu0 %v363_v14 }
  0x5f   :  { %v236_v15 = vpop.permute.xlu2 %235 }
  0x60   :  { %vm244_vm7 = vcmp.eq.s32.totalorder %v236_v15, %v715_v17  ;;  %v362_v15 = vld [vmem:[%s845_s2 + $0x18] sm:$0xff] }
  0x61   :  { %v527_v31 = vsel %vm244_vm7, 1.0, %v642_v20  ;;  %560 = vmatpush.msrb.mxu2 %v362_v15  ;;  %561 = vmatpush.msrb.mxu3 %v362_v15  ;;  %vm418_vm7 = vcmp.lt.s32.totalorder %v715_v17, 16 }
  0x62   :  { %389 = vmatpush.msrb.mxu0 %v362_v15 }
  0x68   :  { %v106_v23 = vpop.permute.xlu2 %105 }
  0x69   :  { %vm114_vm4 = vcmp.eq.s32.totalorder %v106_v23, %v715_v17 }
  0x6a   :  { %v509_v24 = vsel %vm114_vm4, 1.0, %v642_v20  ;;  %vm354_vm4 = vcmask 785408  }
  0x71   :  { %v239_v32 = vpop.permute.xlu2 %238 }
  0x72   :  { %vm245_vm10 = vcmp.eq.s32.totalorder %v239_v32, %v715_v17 }
  0x73   :  { %v528_v35 = vsel %vm245_vm10, 1.0, %v642_v20  ;;  %vm422_vm10 = vcmp.lt.s32.totalorder %v715_v17, 24 }
  0x74   :  { %v168_v18 = vpop.permute.xlu0 %167  ;;  %v103_v19 = vpop.permute.xlu1 %102 }
  0x75   :  { %vm178_vm2 = vcmp.eq.s32.totalorder %v168_v18, %v715_v17  ;;  %vm113_vm3 = vcmp.eq.s32.totalorder %v103_v19, %v715_v17  ;;  %v361_v18 = vld [vmem:[%s845_s2 + $0x10] sm:$0xff]  ;;  %v360_v19 = vld [vmem:[%s845_s2 + $0x8] sm:$0xff] }
  0x76   :  { %v517_v21 = vsel %vm178_vm2, 1.0, %v642_v20  ;;  %v508_v22 = vsel %vm113_vm3, 1.0, %v642_v20  ;;  %562 = vmatpush.msrb.mxu2 %v361_v18  ;;  %563 = vmatpush.msrb.mxu3 %v361_v18  ;;  %vm349_vm3 = vcmask 523264  }
  0x77   :  { %522 = vmatmul.msk.f32.vlgmr.msra.gmra.mxu2 %vm55_vm1, %v517_v21  ;;  %513 = vmatmul.msk.f32.vlgmr.msra.gmra.mxu1 %vm55_vm1, %v508_v22  ;;  %v452_v22 = vld [vmem:[%s846_s3 + $0x10] sm:$0xff] }
  0x78   :  { %390 = vmatpush.msrb.mxu0 %v361_v18  ;;  %564 = vmatpush.msrb.mxu2 %v360_v19 }
  0x79   :  { %v242_v38 = vpop.permute.xlu2 %241  ;;  %565 = vmatpush.msrb.mxu3 %v360_v19  ;;  %474 = vmatpush.msrb.mxu1 %v452_v22 }
  0x7a   :  { %vm246_vm12 = vcmp.eq.s32.totalorder %v242_v38, %v715_v17  ;;  %391 = vmatpush.msrb.mxu0 %v360_v19 }
  0x7b   :  { %v529_v40 = vsel %vm246_vm12, 1.0, %v642_v20 }
  0x7d   :  { %v171_v25 = vpop.permute.xlu1 %170 }
  0x7e   :  { %v233_v26 = vpop.permute.xlu0 %232  ;;  %vm179_vm5 = vcmp.eq.s32.totalorder %v171_v25, %v715_v17 }
  0x7f   :  { %vm243_vm6 = vcmp.eq.s32.totalorder %v233_v26, %v715_v17  ;;  %v518_v27 = vsel %vm179_vm5, 1.0, %v642_v20  ;;  %514 = vmatmul.msk.f32.gmra.mxu1 %vm55_vm1, %v509_v24  ;;  %vm414_vm5 = vcmp.lt.s32.totalorder %v715_v17, 8 }
  0x80   :  { %v526_v28 = vsel %vm243_vm6, 1.0, %v642_v20  ;;  %523 = vmatmul.msk.f32.gmra.mxu2 %vm55_vm1, %v518_v27  ;;  %vm417_vm6 = vcmp.ge.s32.totalorder %v715_v17, 8 }
  0x81   :  { %531 = vmatmul.msk.f32.vlgmr.msra.gmra.mxu3 %vm55_vm1, %v526_v28 }
  0x82   :  { %v33_v42 = vpop.permute.xlu2 %32 }
  0x83   :  { %vm43_vm14 = vcmp.eq.s32.totalorder %v33_v42, %v715_v17 }
  0x84   :  { %v499_v43 = vsel %vm43_vm14, 1.0, %v642_v20  ;;  %vm431_vm14 = vcmask 195584  }
  0x85   :  { %v174_v29 = vpop.permute.xlu1 %173  ;;  %504 = vmatmul.msk.f32.vlgmr.msra.gmra.mxu0 %vm55_vm1, %v499_v43 }
  0x86   :  { %vm180_vm8 = vcmp.eq.s32.totalorder %v174_v29, %v715_v17 }
  0x87   :  { %v109_v30 = vpop.permute.xlu0 %108  ;;  %v519_v33 = vsel %vm180_vm8, 1.0, %v642_v20  ;;  %vm419_vm8 = vmand %vm417_vm6, %vm418_vm7 }
  0x88   :  { %vm115_vm9 = vcmp.eq.s32.totalorder %v109_v30, %v715_v17  ;;  %524 = vmatmul.msk.f32.gmra.mxu2 %vm55_vm1, %v519_v33 }
  0x89   :  { %v510_v34 = vsel %vm115_vm9, 1.0, %v642_v20  ;;  %532 = vmatmul.msk.f32.gmra.mxu3 %vm55_vm1, %v527_v31  ;;  %vm421_vm9 = vcmp.ge.s32.totalorder %v715_v17, 16 }
  0x8a   :  { %515 = vmatmul.msk.f32.gmra.mxu1 %vm55_vm1, %v510_v34  ;;  %v42_v48 = vpop.permute.xlu2 %41 }
  0x8b   :  { %vm46_vm2 = vcmp.eq.s32.totalorder %v42_v48, %v715_v17 }
  0x8c   :  { %v502_v49 = vsel %vm46_vm2, 1.0, %v642_v20 }
  0x8d   :  { %v177_v36 = vpop.permute.xlu1 %176 }
  0x8e   :  { %vm181_vm11 = vcmp.eq.s32.totalorder %v177_v36, %v715_v17 }
  0x8f   :  { %v520_v37 = vsel %vm181_vm11, 1.0, %v642_v20  ;;  %vm423_vm11 = vmand %vm421_vm9, %vm422_vm10 }
  0x90   :  { %525 = vmatmul.msk.f32.gmra.mxu2 %vm55_vm1, %v520_v37  ;;  %v36_v44 = vpop.permute.xlu0 %35 }
  0x91   :  { %533 = vmatmul.msk.f32.gmra.mxu3 %vm55_vm1, %v528_v35  ;;  %vm44_vm15 = vcmp.eq.s32.totalorder %v36_v44, %v715_v17 }
  0x92   :  { %v500_v45 = vsel %vm44_vm15, 1.0, %v642_v20  ;;  %vm457_vm15 = vcmask 1041409  }
  0x93   :  { %505 = vmatmul.msk.f32.gmra.mxu0 %vm55_vm1, %v500_v45 }
  0x96   :  { %v112_v39 = vpop.permute.xlu1 %111 }
  0x97   :  { %vm116_vm13 = vcmp.eq.s32.totalorder %v112_v39, %v715_v17 }
  0x98   :  { %v511_v41 = vsel %vm116_vm13, 1.0, %v642_v20 }
  0x99   :  { %534 = vmatmul.msk.f32.gmra.mxu3 %vm55_vm1, %v529_v40  ;;  %516 = vmatmul.msk.f32.gmra.mxu1 %vm55_vm1, %v511_v41 }
  0x9f   :  { %v39_v46 = vpop.permute.xlu1 %38 }
  0xa0   :  { %vm45_vm0 = vcmp.eq.s32.totalorder %v39_v46, %v715_v17 }
  0xa1   :  { %v501_v47 = vsel %vm45_vm0, 1.0, %v642_v20  ;;  %v359_v20 = vld [vmem:[%s845_s2] sm:$0xff]  ;;  %vm481_vm0 = vcmask 25600  }
  0xa2   :  { %506 = vmatmul.msk.f32.gmra.mxu0 %vm55_vm1, %v501_v47  ;;  %566 = vmatpush.msrb.mxu2 %v359_v20 }
  0xa3   :  { %567 = vmatpush.msrb.mxu3 %v359_v20  ;;  %392 = vmatpush.msrb.mxu0 %v359_v20 }
  0xaa   :  { %507 = vmatmul.msk.f32.gmra.mxu0 %vm55_vm1, %v502_v49  ;;  %vm344_vm1 = vcmask 261120  }
  0xf4   :  { %v154_v50 = vpop.f32.mrf.mxu1 }
  0xfa   :  { %v219_v51 = vpop.f32.mrf.mxu2 }
  0xfc   :  { %v157_v52 = vpop.f32.mrf.mxu1 }
 0x102   :  { %v89_v21 = vpop.f32.mrf.mxu0 }
 0x103   :  { %v222_v53 = vpop.f32.mrf.mxu2 }
 0x104   :  { %v284_v54 = vpop.f32.mrf.mxu3 }
 0x107   :  { %v160_v55 = vpop.f32.mrf.mxu1 }
 0x108   :  { %v589_v56 = vpack.i.bf16 %v160_v55, %v157_v52  ;;  %v450_v55 = vld [vmem:[%s846_s3] sm:$0xff] }
 0x10a   :  { %590 = vrot.lane.b32.xlu1 %v589_v56, %s643_s0  ;;  %v416_v56 = vsel %vm414_vm5, 15, %v641_v13 }
 0x10b   :  { %v225_v57 = vpop.f32.mrf.mxu2 }
 0x10c   :  { %v287_v58 = vpop.f32.mrf.mxu3  ;;  %v594_v59 = vpack.i.bf16 %v225_v57, %v222_v53  ;;  %v411_v57 = vshrl.u32 %v25_v16, 7 }
 0x10e   :  { %595 = vrot.lane.b32.xlu2 %v594_v59, %s644_s1  ;;  %v420_v59 = vsel %vm419_vm8, 14, %v416_v56 }
 0x110   :  { %v92_v23 = vpop.f32.mrf.mxu0 }
 0x113   :  { %v228_v62 = vpop.f32.mrf.mxu2 }
 0x114   :  { %v290_v60 = vpop.f32.mrf.mxu3 }
 0x115   :  { %v599_v61 = vpack.i.bf16 %v290_v60, %v287_v58  ;;  %v610_v58 = vld [vmem:[%s845_s2 + $0x80] ss:$0 sm:$0xff] }
 0x116   :  { %322 = vrot.lane.b32.xlu2 %v228_v62, %s644_s1  ;;  %v163_v63 = vpop.f32.mrf.mxu1 }
 0x117   :  { %600 = vrot.lane.b32.xlu0 %v599_v61, %s645_s11  ;;  %v604_v0 = vpack.i.bf16 %v154_v50, %v163_v63  ;;  %v412_v61 = vadd.s32 8, %v411_v57  ;;  %v424_v63 = vsel %vm423_vm11, 13, %v420_v59 }
 0x118   :  { %vm425_vm13 = vcmp.lt.s32.totalorder %v411_v57, %v424_v63 }
 0x119   :  { %605 = vrot.lane.b32.xlu1 %v604_v0, %s643_s0  ;;  %vm426_vm12 = vcmp.lt.s32.totalorder %v412_v61, %v424_v63 }
 0x11c   :  { %v293_v1 = vpop.f32.mrf.mxu3 }
 0x11e   :  { %332 = vrot.lane.b32.xlu2 %v284_v54, %s645_s11  ;;  %v451_v54 = vld [vmem:[%s846_s3 + $0x8] sm:$0xff] }
 0x11f   :  { %338 = vrot.lane.b32.xlu0 %v293_v1, %s645_s11  ;;  %v95_v26 = vpop.f32.mrf.mxu0  ;;  %475 = vmatpush.msrb.mxu1 %v451_v54 }
 0x121   :  { %316 = vrot.lane.b32.xlu1 %v219_v51, %s644_s1  ;;  %476 = vmatpush.msrb.mxu1 %v450_v55 }
 0x127   :  { %v98_v38 = vpop.f32.mrf.mxu0 }
 0x168   :  { %v596_v24 = vpop.permute.xlu2 %595 }
 0x169   :  { %v597_v29 = vunpack.i.l.bf16 %v596_v24  ;;  %v598_v44 = vunpack.i.h.bf16 %v596_v24 }
 0x170   :  { %v323_v32 = vpop.permute.xlu2 %322 }
 0x178   :  { %v333_v51 = vpop.permute.xlu2 %332 }
 0x17c   :  { %v591_v25 = vpop.permute.xlu1 %590 }
 0x17d   :  { %v592_v27 = vunpack.i.l.bf16 %v591_v25  ;;  %v593_v34 = vunpack.i.h.bf16 %v591_v25 }
 0x17f   :  { %v346_v28 = vsel %vm344_vm1, %v92_v23, %v592_v27  ;;  %v347_v43 = vsel %vm344_vm1, %v95_v26, %v593_v34 }
 0x180   :  { %v351_v33 = vsel %vm349_vm3, %v346_v28, %v597_v29  ;;  %v352_v47 = vsel %vm349_vm3, %v347_v43, %v598_v44 }
 0x189   :  { %v601_v30 = vpop.permute.xlu0 %600 }
 0x18a   :  { %v602_v31 = vunpack.i.l.bf16 %v601_v30  ;;  %v603_v40 = vunpack.i.h.bf16 %v601_v30 }
 0x18b   :  { %v606_v35 = vpop.permute.xlu1 %605 }
 0x18c   :  { %v356_v36 = vsel %vm354_vm4, %v351_v33, %v602_v31  ;;  %v607_v37 = vunpack.i.l.bf16 %v606_v35  ;;  %v608_v41 = vunpack.i.h.bf16 %v606_v35  ;;  %v357_v50 = vsel %vm354_vm4, %v352_v47, %v603_v40  ;;  %v611_v33 = vld [vmem:[%s846_s3 + $0x18] ss:$0 sm:$0xff] }
 0x18d   :  { %396 = vmatmul.f32.vlgmr.msrb.gmra.mxu2 %v356_v36 }
 0x18e   :  { %v348_v39 = vsel %vm344_vm1, %v98_v38, %v607_v37  ;;  %v345_v49 = vsel %vm344_vm1, %v89_v21, %v608_v41 }
 0x18f   :  { %v353_v42 = vsel %vm349_vm3, %v348_v39, %v323_v32 }
 0x191   :  { %v339_v45 = vpop.permute.xlu0 %338 }
 0x192   :  { %v358_v46 = vsel %vm354_vm4, %v353_v42, %v339_v45 }
 0x193   :  { %402 = vmatmul.f32.vlgmr.msrb.gmra.mxu3 %v358_v46  ;;  %v317_v48 = vpop.permute.xlu1 %316 }
 0x194   :  { %v350_v52 = vsel %vm349_vm3, %v345_v49, %v317_v48 }
 0x195   :  { %399 = vmatmul.f32.gmra.mxu2 %v357_v50  ;;  %v355_v53 = vsel %vm354_vm4, %v350_v52, %v333_v51 }
 0x196   :  { %393 = vmatmul.f32.vlgmr.msrb.gmra.mxu0 %v355_v53 }
 0x210   :  { %v397_v60 = vpop.f32.mrf.mxu2 }
 0x211   :  { %v398_v62 = vadd.f32 %v610_v58, %v397_v60 }
 0x213   :  { %v407_v0 = vmax.f32 %v398_v62, 0.0  ;;  %v394_v13 = vpop.f32.mrf.mxu0 }
 0x214   :  { %v395_v1 = vadd.f32 %v610_v58, %v394_v13 }
 0x215   :  { %v428_v17 = vsel %vm426_vm12, %v407_v0, 0.0 }
 0x216   :  { %v403_v2 = vpop.f32.mrf.mxu3  ;;  %v406_v16 = vmax.f32 %v395_v1, 0.0  ;;  %v433_v8 = vsel %vm431_vm14, %v428_v17, -inf }
 0x217   :  { %v404_v3 = vadd.f32 %v610_v58, %v403_v2 }
 0x218   :  { %v400_v4 = vpop.f32.mrf.mxu2  ;;  %v427_v5 = vsel %vm425_vm13, %v406_v16, 0.0 }
 0x219   :  { %v409_v6 = vmax.f32 %v404_v3, 0.0  ;;  %v401_v7 = vadd.f32 %v610_v58, %v400_v4  ;;  %v432_v9 = vsel %vm431_vm14, %v427_v5, -inf }
 0x21a   :  { %v434_v10 = vmax.f32 %v432_v9, %v433_v8 }
 0x21b   :  { %v430_v11 = vsel %vm426_vm12, %v409_v6, 0.0  ;;  %v408_v12 = vmax.f32 %v401_v7, 0.0 }
 0x21c   :  { %v435_v14 = vrot.slane %v434_v10, 4  ;;  %v442_v18 = vsel %vm431_vm14, %v430_v11, -inf }
 0x21d   :  { %v429_v15 = vsel %vm425_vm13, %v408_v12, 0.0 }
 0x21e   :  { %v441_v19 = vsel %vm431_vm14, %v429_v15, -inf  ;;  %v436_v20 = vmax.f32 %v434_v10, %v435_v14 }
 0x21f   :  { %v443_v21 = vmax.f32 %v441_v19, %v442_v18 }
 0x220   :  { %v437_v22 = vrot.slane %v436_v20, 2 }
 0x221   :  { %v444_v23 = vrot.slane %v443_v21, 4 }
 0x222   :  { %v438_v24 = vmax.f32 %v436_v20, %v437_v22 }
 0x223   :  { %v445_v25 = vmax.f32 %v443_v21, %v444_v23 }
 0x224   :  { %v439_v28 = vrot.slane %v438_v24, 1 }
 0x225   :  { %v446_v26 = vrot.slane %v445_v25, 2 }
 0x226   :  { %v440_v30 = vmax.f32 %v438_v24, %v439_v28 }
 0x227   :  { %v447_v27 = vmax.f32 %v445_v25, %v446_v26 }
 0x229   :  { %v448_v29 = vrot.slane %v447_v27, 1 }
 0x22b   :  { %v449_v31 = vmax.f32 %v447_v27, %v448_v29 }
 0x22d   :  { %v458_v32 = vsel %vm457_vm15, %v449_v31, %v440_v30 }
 0x22e   :  { %535 = vmatmul.msk.f32.vlgmr.msrb.gmra.mxu1 %vm431_vm14, %v458_v32 }
 0x2ab   :  { %v478_v34 = vpop.f32.mrf.mxu1 }
 0x2ac   :  { %v479_v35 = vadd.f32 %v611_v33, %v478_v34 }
 0x2ae   :  { %482 = vst.msk [vmem:[#allocation2] sm:$0x3] %vm481_vm0, %v479_v35 }
 0x2af   :  { %493 = dma.vmem_to_hbm [thread:$0]  %s489_s26, 32, %s491_s29, [#allocation3]  }
 0x2b0   :  { %636 = dma.done.wait [#allocation3], 32  }
 0x2b1   :  { %637 = vsyncadd [#allocation3], 4294967264 }
 0x2b2   :  { %498 = vsyncpa [#allocation3], 1 }

</bundles_post_ra>
